<compile_context>
chip_gen: v6e
topology: v6e:2x2x1
jax: 0.10.0
libtpu: 0.0.40
codegen_flags: <defaults>
</compile_context>

<pallas_src>
import functools

import jax
import jax.numpy as jnp
from jax.experimental import pallas as pl
from jax.experimental.pallas import tpu as pltpu


def fc_block_kernel(x_ref, v_ref, scale_ref, b_ref, o_ref, *, slope):
    # x: [tm, in]  v: [out, in]  scale: (1,1) SMEM f32  b: [1, out]  o: [tm, out]
    # Contract x's dim 1 with v's dim 1 -> [tm, out]; MXU gets the transposed
    # weight for free (no XLU transpose), f32 accumulation.
    y = jax.lax.dot_general(
        x_ref[...], v_ref[...],
        dimension_numbers=(((1,), (1,)), ((), ())),
        preferred_element_type=jnp.float32,
    )
    # Uniform WeightNorm scale applied to the small [tm, out] result, then bias.
    y = y * scale_ref[0, 0] + b_ref[...].astype(jnp.float32)
    # LeakyReLU (negative_slope is a compile-time constant).
    y = jnp.where(y >= 0.0, y, jnp.float32(slope) * y)
    o_ref[...] = y.astype(o_ref.dtype)


def _pick_m_tile(m):
    """Lane/sublane friendly batch tile: big power-of-two divisor, else full M."""
    for cand in (512, 256, 128):
        if m % cand == 0:
            return cand
    return m


def fc_block(x, v, g, b, *, slope):
    """One FcBlock forward.

    x: [B, in_f], v: [out_f, in_f] (PyTorch Linear layout), g: scalar,
    b: [1, out_f]  ->  [B, out_f]
    """
    B, in_f = x.shape
    out_f = v.shape[0]

    # Hoisted WeightNorm scalar: scale = g * rsqrt(||v||_F^2), computed in f32
    # outside the kernel (EUP rsqrt instead of sqrt + divide).
    v32 = v.astype(jnp.float32)
    scale = (g.astype(jnp.float32).reshape(()) *
             jax.lax.rsqrt(jnp.sum(v32 * v32))).reshape(1, 1)

    tm = _pick_m_tile(B)
    grid = (B // tm,)

    kernel = functools.partial(fc_block_kernel, slope=slope)

    return pl.pallas_call(
        kernel,
        out_shape=jax.ShapeDtypeStruct((B, out_f), x.dtype),
        grid=grid,
        in_specs=[
            pl.BlockSpec((tm, in_f), lambda i: (i, 0)),              # x tile (pipelined)
            pl.BlockSpec((out_f, in_f), lambda i: (0, 0)),           # v, full, VMEM-resident
            pl.BlockSpec(memory_space=pltpu.MemorySpace.SMEM),       # scale scalar in SMEM
            pl.BlockSpec((1, out_f), lambda i: (0, 0)),              # bias, full
        ],
        out_specs=pl.BlockSpec((tm, out_f), lambda i: (i, 0)),
        compiler_params=pltpu.CompilerParams(
            dimension_semantics=("parallel",),
        ),
    )(x, v, scale, b)


def encoder_forward(x, params, *, slope):
    """Encoder.forward: first -> hidden1 -> hidden2 (features) -> last."""
    features = None
    for li, (v, g, b) in enumerate(params):
        x = fc_block(x, v, g, b, slope=slope)
        if li == 2:
            features = x  # mirrors `self.features = x`
    return x, features


# ---------------------------------------------------------------------------
# Pure-JAX reference of the same forward semantics (eval-mode dropout).
# ---------------------------------------------------------------------------
def encoder_ref(x, params, *, slope):
    for (v, g, b) in params:
        w = v * (g / jnp.sqrt(jnp.sum(v.astype(jnp.float32) ** 2)))
        y = x @ w.T + b
        x = jnp.where(y >= 0.0, y, slope * y)
    return x


if __name__ == "__main__":
    key = jax.random.PRNGKey(0)

    B = 8
    hparams = {
        "enc_in_features": 32,
        "enc_hidden1_features": 64,
        "enc_hidden2_features": 64,
        "enc_hidden3_features": 32,
        "enc_out_features": 16,
        "leaky_relu_slope": 0.2,
        "dropout_proba": 0.5,
    }
    dims = [
        hparams["enc_in_features"],
        hparams["enc_hidden1_features"],
        hparams["enc_hidden2_features"],
        hparams["enc_hidden3_features"],
        hparams["enc_out_features"],
    ]
    slope = hparams["leaky_relu_slope"]

    keys = jax.random.split(key, 1 + 2 * 4)
    kx = keys[0]

    # Deterministic parameter init mirroring WeightNorm._reset():
    #   w0 ~ init,  g = ||w0||_F,  v = w0 / g
    params = []
    for li in range(4):
        kw, kb = keys[1 + 2 * li], keys[2 + 2 * li]
        out_f, in_f = dims[li + 1], dims[li]
        w0 = jax.random.normal(kw, (out_f, in_f), dtype=jnp.float32) * 0.1
        bias = (jax.random.normal(kb, (out_f,), dtype=jnp.float32) * 0.1
                ).reshape(1, out_f)
        g = jnp.sqrt(jnp.sum(w0 * w0))
        v = w0 / g
        params.append((v, g, bias))

    x = jax.random.normal(kx, (B, dims[0]), dtype=jnp.float32)

    y, feats = encoder_forward(x, params, slope=slope)
    y = jax.block_until_ready(y)

    y_ref = encoder_ref(x, params, slope=slope)

    assert y.shape == (B, dims[-1])
    assert feats.shape == (B, dims[3])
    assert jnp.allclose(y, y_ref, atol=1e-4, rtol=1e-4), "mismatch vs reference"

    print("KERNEL_OK")
</pallas_src>

<mosaic_0001>
module attributes {stable_mosaic.version = 11 : i64} {
  func.func @fc_block_kernel(%arg0: i32, %arg1: memref<8x32xf32, #tpu.memory_space<vmem>>, %arg2: memref<64x32xf32, #tpu.memory_space<vmem>>, %arg3: memref<1x1xf32, #tpu.memory_space<smem>>, %arg4: memref<1x64xf32, #tpu.memory_space<vmem>>, %arg5: memref<8x64xf32, #tpu.memory_space<vmem>>) attributes {dimension_semantics = [#tpu.dimension_semantics<parallel>], iteration_bounds = array<i64: 1>, scalar_prefetch = 0 : i64, scratch_operands = 0 : i64, tpu.core_type = #tpu.core_type<tc>, window_params = [{transform_indices = @transform_0, window_bounds = array<i64: 8, 32>}, {pipeline_mode = #tpu.pipeline_mode<synchronous>, transform_indices = @transform_1, window_bounds = array<i64: 64, 32>}, {transform_indices = @transform_2, window_bounds = array<i64: 1, 1>}, {pipeline_mode = #tpu.pipeline_mode<synchronous>, transform_indices = @transform_3, window_bounds = array<i64: 1, 64>}, {transform_indices = @transform_4, window_bounds = array<i64: 8, 64>}]} {
    %c0 = arith.constant 0 : index
    %c0_0 = arith.constant 0 : index
    %0 = vector.load %arg1[%c0, %c0_0] : memref<8x32xf32, #tpu.memory_space<vmem>>, vector<8x32xf32>
    %c0_1 = arith.constant 0 : index
    %c0_2 = arith.constant 0 : index
    %1 = vector.load %arg2[%c0_1, %c0_2] : memref<64x32xf32, #tpu.memory_space<vmem>>, vector<64x32xf32>
    %cst = arith.constant dense<0.000000e+00> : vector<8x64xf32>
    %2 = tpu.matmul %0, %1, %cst {dimension_numbers = #tpu.dot_dimension_numbers<[1], [1], [0], [0], [0, 0, 1, 0], [], []>} : vector<8x32xf32>, vector<64x32xf32>, vector<8x64xf32> -> vector<8x64xf32>
    %c0_3 = arith.constant 0 : index
    %c0_4 = arith.constant 0 : index
    %3 = memref.load %arg3[%c0_3, %c0_4] : memref<1x1xf32, #tpu.memory_space<smem>>
    %4 = vector.broadcast %3 : f32 to vector<8x64xf32>
    %5 = arith.mulf %2, %4 : vector<8x64xf32>
    %c0_5 = arith.constant 0 : index
    %c0_6 = arith.constant 0 : index
    %6 = vector.load %arg4[%c0_5, %c0_6] : memref<1x64xf32, #tpu.memory_space<vmem>>, vector<1x64xf32>
    %7 = vector.broadcast %6 : vector<1x64xf32> to vector<8x64xf32>
    %8 = arith.addf %5, %7 : vector<8x64xf32>
    %cst_7 = arith.constant 0.000000e+00 : f32
    %9 = vector.broadcast %cst_7 : f32 to vector<8x64xf32>
    %10 = arith.cmpf oge, %8, %9 : vector<8x64xf32>
    %cst_8 = arith.constant 2.000000e-01 : f32
    %11 = vector.broadcast %cst_8 : f32 to vector<8x64xf32>
    %12 = arith.mulf %11, %8 : vector<8x64xf32>
    %13 = arith.select %10, %8, %12 : vector<8x64xi1>, vector<8x64xf32>
    %c0_9 = arith.constant 0 : index
    %c0_10 = arith.constant 0 : index
    %14 = vector.load %arg5[%c0_9, %c0_10] : memref<8x64xf32, #tpu.memory_space<vmem>>, vector<8x64xf32>
    tpu.vector_store %arg5[%c0_9, %c0_10], %13 {strides = array<i32>} : memref<8x64xf32, #tpu.memory_space<vmem>>, vector<8x64xf32>,
    return
  }
  func.func @transform_0(%arg0: i32) -> (i32, i32) {
    %c0_i32 = arith.constant 0 : i32
    %c0_i32_0 = arith.constant 0 : i32
    return %arg0, %c0_i32 : i32, i32
  }
  func.func @transform_1(%arg0: i32) -> (i32, i32) {
    %c0_i32 = arith.constant 0 : i32
    %c0_i32_0 = arith.constant 0 : i32
    %c0_i32_1 = arith.constant 0 : i32
    return %c0_i32, %c0_i32_0 : i32, i32
  }
  func.func @transform_2(%arg0: i32) -> (i32, i32) {
    %c0_i32 = arith.constant 0 : i32
    %c0_i32_0 = arith.constant 0 : i32
    %c0_i32_1 = arith.constant 0 : i32
    return %c0_i32, %c0_i32_0 : i32, i32
  }
  func.func @transform_3(%arg0: i32) -> (i32, i32) {
    %c0_i32 = arith.constant 0 : i32
    %c0_i32_0 = arith.constant 0 : i32
    %c0_i32_1 = arith.constant 0 : i32
    return %c0_i32, %c0_i32_0 : i32, i32
  }
  func.func @transform_4(%arg0: i32) -> (i32, i32) {
    %c0_i32 = arith.constant 0 : i32
    %c0_i32_0 = arith.constant 0 : i32
    return %arg0, %c0_i32 : i32, i32
  }
}

</mosaic_0001>

<bundles_post_ra>
// kernel: tpu_custom_call.1
= control target key start
LH: loop header
LB: loop body
LE: loop exit
PB: predicated region body
PF: predicated region fallthrough
CT: control target
= control target key end

     0   :  { %vm28_vm0 = vcmask 261120   ;;  %v219_v1 = vmov 0.0   ;;  %vm220_vm1 = vmmov 0   ;;  %s292_s0 = inlined_call_operand.vmem [shape: f32[8,32], index: 0, kind: input, shape index: {}]   ;;  %s293_s1 = inlined_call_operand.vmem [shape: f32[64,32], index: 1, kind: input, shape index: {}]   ;;  %s294_s2 = inlined_call_operand.<no memory space> [shape: f32[1,1], index: 2, kind: input, shape index: {}]   ;;  %s295_s3 = inlined_call_operand.vmem [shape: f32[1,64], index: 3, kind: input, shape index: {}]   ;;  %s296_s4 = inlined_call_operand.hbm [shape: f32[8,64], index: 4, kind: output, shape index: {}]  }
   0x1   :  { %v27_v0 = vld [vmem:[%s293_s1 + $0x38] sm:$0xff]  ;;  %175 = vmatprep.subr.mxu0 %v219_v1  ;;  %191 = vmatprep.mubr.msk.f32.mxu0 %vm220_vm1, %v219_v1  ;;  %v26_v2 = vld [vmem:[%s293_s1 + $0x30] sm:$0xff] }
   0x2   :  { %176 = vmatpush3.xpose.msk.msra.mxu0 %vm28_vm0, %v27_v0 }
   0x3   :  { %177 = vmatprep.subr.mxu0 %v219_v1 }
   0x4   :  { %10 = vsyncpa [#allocation4], 0  ;;  %v25_v3 = vld [vmem:[%s293_s1 + $0x28] sm:$0xff]  ;;  %v24_v4 = vld [vmem:[%s293_s1 + $0x20] sm:$0xff]  ;;  %v127_v10 = vstv %s294_s2  ;;  %vm140_vm3 = vcmask 523264  }
   0x5   :  { %v23_v5 = vld [vmem:[%s293_s1 + $0x18] sm:$0xff]  ;;  %v22_v6 = vld [vmem:[%s293_s1 + $0x10] sm:$0xff]  ;;  %v21_v7 = vld [vmem:[%s293_s1 + $0x8] sm:$0xff] }
   0x6   :  { %178 = vmatpush3.xpose.msk.msra.mxu0 %vm28_vm0, %v26_v2  ;;  %v20_v8 = vld [vmem:[%s293_s1] sm:$0xff]  ;;  %s221_s1 = smov [#allocation3]  }
   0x7   :  { %179 = vmatprep.subr.mxu0 %v219_v1  ;;  %v19_v9 = vld [vmem:[%s292_s0] sm:$0xff]  ;;  %s148_s11 = sshll.u32 %s221_s1, 4  ;;  %s149_s11 = int_to_ptr.vmem [resolvable:$true] %s148_s11 }
   0x8   :  { %v165_v12 = vld [vmem:[%s295_s3] ss:$0 sm:$0xff]  ;;  %s197_s0 = scalar_lea.vmem %s149_s11, 128  ;;  %p202_p1 = scmp.lt.s32.totalorder %s149_s11, %s149_s11 }
   0x9   :  { %p198_p0 = scmp.ne.s32.totalorder %s149_s11, %s197_s0  ;;  %p203_p2 = scmp.lt.s32.totalorder %s197_s0, %s197_s0 }
   0xa   :  { %180 = vmatpush3.xpose.msk.msra.mxu0 %vm28_vm0, %v25_v3 }
   0xb   :  { %181 = vmatprep.subr.mxu0 %v219_v1  ;;  %p204_p3 = por %p203_p2, %p202_p1 }
   0xd   :  { %p205_p4 = pnand %p204_p3, %p198_p0 }
   0xe   :  { %182 = vmatpush3.xpose.msk.msra.mxu0 %vm28_vm0, %v24_v4 }
   0xf   :  { %183 = vmatprep.subr.mxu0 %v219_v1 }
  0x12   :  { %184 = vmatpush3.xpose.msk.msra.mxu0 %vm28_vm0, %v23_v5 }
  0x13   :  { %185 = vmatprep.subr.mxu0 %v219_v1 }
  0x16   :  { %186 = vmatpush3.xpose.msk.msra.mxu0 %vm28_vm0, %v22_v6 }
  0x17   :  { %187 = vmatprep.subr.mxu0 %v219_v1 }
  0x1a   :  { %188 = vmatpush3.xpose.msk.msra.mxu0 %vm28_vm0, %v21_v7 }
  0x1b   :  { %189 = vmatprep.subr.mxu0 %v219_v1 }
  0x1e   :  { %190 = vmatpush3.xpose.msk.msra.mxu0 %vm28_vm0, %v20_v8 }
  0x21   :  { %192 = vmatmul.mubr.msk.f32.vlgmr.msra.gmra.mxu0 %vm28_vm0, %v19_v9 }
  0xe1   :  { %v122_v11 = vpop.f32.mrf.mxu0 }
  0xe2   :  { %v128_v13 = vmul.f32 %v127_v10, %v122_v11 }
  0xe3   :  { %v193_v14 = vpop.f32.mrf.mxu0 }
  0xe4   :  { %v136_v15 = vadd.f32 %v165_v12, %v128_v13 }
  0xe6   :  { %v138_v16 = vmul.f32 0.2, %v136_v15  ;;  %vm137_vm2 = vcmp.ge.f32.partialorder %v136_v15, 0.0 }
  0xe8   :  { %v139_v17 = vsel %vm137_vm2, %v136_v15, %v138_v16 }
  0xe9   :  { %141 = vst.msk [vmem:[#allocation3] sm:$0xff] %vm140_vm3, %v139_v17 }
  0xea   :  { %208 = shalt.err (!%p205_p4)
}
  0xeb   :  { %151 = dma.vmem_to_hbm [thread:$0]  %s149_s11, 128, %s296_s4, [#allocation4]  }
  0xec   :  { %217 = dma.done.wait [#allocation4], 128  }
  0xed   :  { %218 = vsyncadd [#allocation4], 4294967168 }
  0xee   :  { %155 = vsyncpa [#allocation4], 1 }

</bundles_post_ra>
